<compile_context>
chip_gen: v7x
topology: tpu7x:2x2x1
jax: 0.10.0
libtpu: 0.0.40
codegen_flags: <defaults>
</compile_context>

<pallas_src>
import jax
import jax.numpy as jnp
from jax import lax
from jax.experimental import pallas as pl
from jax.experimental.pallas import tpu as pltpu


def _score_matmul_kernel(u_ref, it_ref, o_ref):
    # u_ref: (tm, D), it_ref: (tn, D)  ->  o_ref: (tm, tn) = u @ it.T
    # Contract dim 1 with dim 1 (no transpose materialized; MXU handles it).
    o_ref[...] = lax.dot_general(
        u_ref[...], it_ref[...],
        dimension_numbers=(((1,), (1,)), ((), ())),
        preferred_element_type=jnp.float32,
    ).astype(o_ref.dtype)


def _round_up(x, m):
    return ((x + m - 1) // m) * m


def amf_forward(users, pos_items, user_table, item_table, *,
                compute_dtype=jnp.float32):
    """users: (Bu,) int, pos_items: (Bi,) int,
    user_table: (n_user, D) f32, item_table: (n_item, D) f32.
    Returns score: (Bu, Bi) f32 == embedding_user(users) @ embedding_item(pos_items).T
    """
    bu = users.shape[0]
    bi = pos_items.shape[0]
    d = user_table.shape[1]

    # --- Row gather in the wrapper: only Bu*D + Bi*D rows touch HBM. ---
    users_emb = jnp.take(
        user_table, users.astype(jnp.int32), axis=0).astype(compute_dtype)   # (Bu, D)
    items_emb = jnp.take(
        item_table, pos_items.astype(jnp.int32), axis=0).astype(compute_dtype)  # (Bi, D)

    # --- Large tiles: Bu on sublanes (mult of 8), Bi lane-dense (mult of 128). ---
    # Double-buffered VMEM @ tm=512, tn=1024, D=64, f32:
    #   2*(512*64 + 1024*64 + 512*1024)*4 B ~= 4.8 MiB  (fits every generation).
    tm = min(_round_up(bu, 8), 512)
    tn = min(_round_up(bi, 128), 1024)
    grid = (pl.cdiv(bu, tm), pl.cdiv(bi, tn))

    itemsize = jnp.dtype(compute_dtype).itemsize
    cost = pl.CostEstimate(
        flops=2 * bu * bi * d,
        transcendentals=0,
        # user slab read once, item slab re-read once per row tile, score written once
        bytes_accessed=(bu * d + grid[0] * bi * d) * itemsize + bu * bi * 4,
    )

    score = pl.pallas_call(
        _score_matmul_kernel,
        out_shape=jax.ShapeDtypeStruct((bu, bi), jnp.float32),
        grid=grid,
        in_specs=[
            # (tm, D): last dim equals full array extent -> exempt from 128 rule.
            pl.BlockSpec((tm, d), lambda i, j: (i, 0)),
            # (tn, D): item rows tiled along grid axis j; D kept whole.
            pl.BlockSpec((tn, d), lambda i, j: (j, 0)),
        ],
        out_specs=pl.BlockSpec((tm, tn), lambda i, j: (i, j)),
        compiler_params=pltpu.CompilerParams(
            dimension_semantics=("parallel", "parallel")),
        cost_estimate=cost,
    )(users_emb, items_emb)

    return score


def _reference(users, pos_items, user_table, item_table):
    return jnp.take(user_table, users, axis=0) @ jnp.take(
        item_table, pos_items, axis=0).T


if __name__ == "__main__":
    key = jax.random.PRNGKey(0)
    k_u, k_i, k_uid, k_iid, k_uid2, k_iid2 = jax.random.split(key, 6)

    # --- Small config (matches a toy AMF: embed_size=32). ---
    n_user, n_item, emb_size = 64, 80, 32
    bu, bi = 8, 8

    # nn.init.normal_(weight, std=0.1)
    user_table = (0.1 * jax.random.normal(k_u, (n_user, emb_size))).astype(jnp.float32)
    item_table = (0.1 * jax.random.normal(k_i, (n_item, emb_size))).astype(jnp.float32)

    users = jax.random.randint(k_uid, (bu,), 0, n_user, dtype=jnp.int32)
    pos_items = jax.random.randint(k_iid, (bi,), 0, n_item, dtype=jnp.int32)

    score = jax.block_until_ready(amf_forward(users, pos_items, user_table, item_table))
    ref = _reference(users, pos_items, user_table, item_table)
    assert score.shape == (bu, bi)
    assert jnp.allclose(score, ref, atol=1e-5, rtol=1e-5), "small-case mismatch"

    # --- Larger, non-8/128-aligned case exercising edge-tile masking. ---
    n_user2, n_item2, emb2 = 1000, 1200, 64
    bu2, bi2 = 200, 300
    user_table2 = (0.1 * jax.random.normal(k_u, (n_user2, emb2))).astype(jnp.float32)
    item_table2 = (0.1 * jax.random.normal(k_i, (n_item2, emb2))).astype(jnp.float32)
    users2 = jax.random.randint(k_uid2, (bu2,), 0, n_user2, dtype=jnp.int32)
    pos_items2 = jax.random.randint(k_iid2, (bi2,), 0, n_item2, dtype=jnp.int32)

    score2 = jax.block_until_ready(
        amf_forward(users2, pos_items2, user_table2, item_table2))
    ref2 = _reference(users2, pos_items2, user_table2, item_table2)
    assert score2.shape == (bu2, bi2)
    assert jnp.allclose(score2, ref2, atol=1e-4, rtol=1e-4), "edge-tile-case mismatch"

    # --- Tiled case: forces a multi-step 2-D grid with the large-tile caps. ---
    bu3, bi3 = 1100, 2500
    users3 = jax.random.randint(k_uid2, (bu3,), 0, n_user2, dtype=jnp.int32)
    pos_items3 = jax.random.randint(k_iid2, (bi3,), 0, n_item2, dtype=jnp.int32)
    score3 = jax.block_until_ready(
        amf_forward(users3, pos_items3, user_table2, item_table2))
    ref3 = _reference(users3, pos_items3, user_table2, item_table2)
    assert score3.shape == (bu3, bi3)
    assert jnp.allclose(score3, ref3, atol=1e-4, rtol=1e-4), "tiled-case mismatch"

    print("KERNEL_OK")
</pallas_src>

<mosaic_0001>
module attributes {stable_mosaic.version = 11 : i64} {
  func.func @_score_matmul_kernel(%arg0: i32, %arg1: i32, %arg2: memref<8x32xf32, #tpu.memory_space<vmem>>, %arg3: memref<128x32xf32, #tpu.memory_space<vmem>>, %arg4: memref<8x128xf32, #tpu.memory_space<vmem>>) attributes {dimension_semantics = [#tpu.dimension_semantics<parallel>, #tpu.dimension_semantics<parallel>], iteration_bounds = array<i64: 1, 1>, scalar_prefetch = 0 : i64, scratch_operands = 0 : i64, tpu.core_type = #tpu.core_type<tc>, window_params = [{transform_indices = @transform_0, window_bounds = array<i64: 8, 32>}, {transform_indices = @transform_1, window_bounds = array<i64: 128, 32>}, {transform_indices = @transform_2, window_bounds = array<i64: 8, 128>}]} {
    %c0 = arith.constant 0 : index
    %c0_0 = arith.constant 0 : index
    %0 = vector.load %arg2[%c0, %c0_0] : memref<8x32xf32, #tpu.memory_space<vmem>>, vector<8x32xf32>
    %c0_1 = arith.constant 0 : index
    %c0_2 = arith.constant 0 : index
    %1 = vector.load %arg3[%c0_1, %c0_2] : memref<128x32xf32, #tpu.memory_space<vmem>>, vector<128x32xf32>
    %cst = arith.constant dense<0.000000e+00> : vector<8x128xf32>
    %2 = tpu.matmul %0, %1, %cst {dimension_numbers = #tpu.dot_dimension_numbers<[1], [1], [0], [0], [0, 0, 1, 0], [], []>} : vector<8x32xf32>, vector<128x32xf32>, vector<8x128xf32> -> vector<8x128xf32>
    %c0_3 = arith.constant 0 : index
    %c0_4 = arith.constant 0 : index
    %3 = vector.load %arg4[%c0_3, %c0_4] : memref<8x128xf32, #tpu.memory_space<vmem>>, vector<8x128xf32>
    tpu.vector_store %arg4[%c0_3, %c0_4], %2 {strides = array<i32>} : memref<8x128xf32, #tpu.memory_space<vmem>>, vector<8x128xf32>,
    return
  }
  func.func @transform_0(%arg0: i32, %arg1: i32) -> (i32, i32) {
    %c0_i32 = arith.constant 0 : i32
    %c0_i32_0 = arith.constant 0 : i32
    return %arg0, %c0_i32 : i32, i32
  }
  func.func @transform_1(%arg0: i32, %arg1: i32) -> (i32, i32) {
    %c0_i32 = arith.constant 0 : i32
    %c0_i32_0 = arith.constant 0 : i32
    return %arg1, %c0_i32 : i32, i32
  }
  func.func @transform_2(%arg0: i32, %arg1: i32) -> (i32, i32) {
    %c0_i32 = arith.constant 0 : i32
    return %arg0, %arg1 : i32, i32
  }
}

</mosaic_0001>

<bundles_post_ra>
// kernel: tpu_custom_call.1
= control target key start
LH: loop header
LB: loop body
LE: loop exit
PB: predicated region body
PF: predicated region fallthrough
CT: control target
= control target key end

     0   :  { %7 = vsyncpa [#allocation3], 0  ;;  %s457_s0 = inlined_call_operand.hbm [shape: f32[8,32], index: 0, kind: input, shape index: {}]   ;;  %s458_s1 = inlined_call_operand.hbm [shape: f32[8,32], index: 1, kind: input, shape index: {}]   ;;  %s459_s2 = inlined_call_operand.hbm [shape: f32[8,8], index: 2, kind: output, shape index: {}]  }
   0x1   :  { %8 = vsyncpa [#allocation6], 0 }
   0x2   :  { %9 = vsyncpa [#allocation4], 0  ;;  %s375_s9 = smov [#allocation2]   ;;  %s303_s13 = scalar_lea.hbm %s457_s0, 128 }
   0x3   :  { %s16_s10 = sshll.u32 %s375_s9, 4  ;;  %p304_p0 = scmp.ne.s32.totalorder %s457_s0, %s303_s13  ;;  %s17_s10 = int_to_ptr.vmem [resolvable:$true] %s16_s10 }
   0x4   :  { %p307_p1 = scmp.lt.u32.totalorder %s303_s13, %s457_s0 }
   0x6   :  { %p309_p2 = pnand %p307_p1, %p304_p0 }
   0x8   :  { %312 = shalt.err (!%p309_p2)
}
   0x9   :  { %s313_s18 = scalar_lea.vmem %s17_s10, 128  ;;  %p318_p4 = scmp.lt.s32.totalorder %s17_s10, %s17_s10 }
   0xa   :  { %p314_p3 = scmp.ne.s32.totalorder %s17_s10, %s313_s18  ;;  %p319_p5 = scmp.lt.s32.totalorder %s313_s18, %s313_s18 }
   0xc   :  { %p320_p6 = por %p319_p5, %p318_p4 }
   0xe   :  { %p321_p7 = pnand %p320_p6, %p314_p3 }
  0x10   :  { %324 = shalt.err (!%p321_p7)
}
  0x11   :  { %19 = dma.hbm_to_vmem [thread:$0]  %s457_s0, 128, %s17_s10, [#allocation3]  }
  0x12   :  { %24 = vsyncadd [#allocation6], 1920  ;;  %s376_s21 = smov [#allocation5]   ;;  %s325_s25 = scalar_lea.hbm %s458_s1, 128 }
  0x13   :  { %s25_s22 = sshll.u32 %s376_s21, 4  ;;  %p326_p8 = scmp.ne.s32.totalorder %s458_s1, %s325_s25  ;;  %s26_s22 = int_to_ptr.vmem [resolvable:$true] %s25_s22 }
  0x14   :  { %p329_p9 = scmp.lt.u32.totalorder %s325_s25, %s458_s1 }
  0x16   :  { %p331_p10 = pnand %p329_p9, %p326_p8 }
  0x18   :  { %334 = shalt.err (!%p331_p10)
}
  0x19   :  { %s335_s30 = scalar_lea.vmem %s26_s22, 128  ;;  %s339_s0 = scalar_lea.vmem %s26_s22, 2048 }
  0x1a   :  { %p336_p11 = scmp.ne.s32.totalorder %s26_s22, %s335_s30  ;;  %p340_p12 = scmp.lt.s32.totalorder %s26_s22, %s26_s22 }
  0x1b   :  { %p341_p13 = scmp.lt.s32.totalorder %s339_s0, %s335_s30 }
  0x1d   :  { %p342_p0 = por %p341_p13, %p340_p12 }
  0x1f   :  { %p343_p1 = pnand %p342_p0, %p336_p11 }
  0x21   :  { %346 = shalt.err (!%p343_p1)
}
  0x22   :  { %s377_s3 = smov 128   ;;  %s378_s4 = smov 8  }
  0x23   :  { %31 = dma.hbm_to_vmem [thread:$0]  %s458_s1, 128, %s26_s22, [#allocation6], %s377_s3, %s377_s3, %s378_s4  }
  0x24   :  { %369 = dma.done.wait [#allocation3], 128  }
  0x25   :  { %370 = vsyncadd [#allocation3], 4294967168 }
  0x26   :  { %371 = dma.done.wait [#allocation6], 2048  }
  0x27   :  { %372 = vsyncadd [#allocation6], 4294965248  ;;  %v379_v0 = vmov 0.0|0.0   ;;  %vm380_vm0 = vmmov 0   ;;  %v381_v1 = vmov 0.0   ;;  %vm55_vm1 = vcmask 261120  }
  0x28   :  { %263 = vmatprep.subr.bf16.mxu0 %v379_v0  ;;  %260 = vmatprep.mubr.msk.f32.mxu0 %vm380_vm0, %v381_v1  ;;  %v39_v2 = vld [vmem:[#allocation5] sm:$0xff]  ;;  %v40_v3 = vld [vmem:[#allocation5 + $0x8] sm:$0xff]  ;;  %vm424_vm2 = vmpackc.low %vm55_vm1, %vm55_vm1  ;;  %s382_s1 = smov [#allocation7]  }
  0x29   :  { %v264_v5 = vpack.c.bf16 %v40_v3, %v39_v2  ;;  %v41_v6 = vld [vmem:[#allocation5 + $0x10] sm:$0xff]  ;;  %v42_v7 = vld [vmem:[#allocation5 + $0x18] sm:$0xff]  ;;  %v43_v9 = vld [vmem:[#allocation5 + $0x20] sm:$0xff]  ;;  %s184_s7 = sshll.u32 %s382_s1, 4  ;;  %s185_s7 = int_to_ptr.vmem [resolvable:$true] %s184_s7 }
  0x2a   :  { %v268_v8 = vpack.c.bf16 %v42_v7, %v41_v6  ;;  %v44_v10 = vld [vmem:[#allocation5 + $0x28] sm:$0xff]  ;;  %v45_v12 = vld [vmem:[#allocation5 + $0x30] sm:$0xff]  ;;  %v46_v13 = vld [vmem:[#allocation5 + $0x38] sm:$0xff]  ;;  %s347_s8 = scalar_lea.vmem %s185_s7, 128  ;;  %p352_p3 = scmp.lt.s32.totalorder %s185_s7, %s185_s7 }
  0x2b   :  { %266 = vmatpush3.bf16.xpose.msk.msra.mxu0 %vm424_vm2, %v264_v5  ;;  %v272_v11 = vpack.c.bf16 %v44_v10, %v43_v9  ;;  %v276_v14 = vpack.c.bf16 %v46_v13, %v45_v12  ;;  %v47_v15 = vld [vmem:[#allocation5 + $0x40] sm:$0xff]  ;;  %v48_v16 = vld [vmem:[#allocation5 + $0x48] sm:$0xff]  ;;  %v49_v18 = vld [vmem:[#allocation5 + $0x50] sm:$0xff]  ;;  %p348_p2 = scmp.ne.s32.totalorder %s185_s7, %s347_s8  ;;  %p353_p4 = scmp.lt.s32.totalorder %s347_s8, %s347_s8 }
  0x2c   :  { %267 = vmatprep.subr.bf16.mxu0 %v379_v0  ;;  %v280_v17 = vpack.c.bf16 %v48_v16, %v47_v15  ;;  %v50_v19 = vld [vmem:[#allocation5 + $0x58] sm:$0xff]  ;;  %v51_v21 = vld [vmem:[#allocation5 + $0x60] sm:$0xff]  ;;  %v52_v22 = vld [vmem:[#allocation5 + $0x68] sm:$0xff] }
  0x2d   :  { %v284_v20 = vpack.c.bf16 %v50_v19, %v49_v18  ;;  %v288_v23 = vpack.c.bf16 %v52_v22, %v51_v21  ;;  %v53_v24 = vld [vmem:[#allocation5 + $0x70] sm:$0xff]  ;;  %v54_v25 = vld [vmem:[#allocation5 + $0x78] sm:$0xff]  ;;  %p354_p5 = por %p353_p4, %p352_p3 }
  0x2e   :  { %v292_v26 = vpack.c.bf16 %v54_v25, %v53_v24  ;;  %v38_v27 = vld [vmem:[#allocation2] sm:$0xff] }
  0x2f   :  { %p355_p6 = pnand %p354_p5, %p348_p2 }
  0x33   :  { %270 = vmatpush3.bf16.xpose.msk.msra.mxu0 %vm424_vm2, %v268_v8 }
  0x34   :  { %271 = vmatprep.subr.bf16.mxu0 %v379_v0 }
  0x3b   :  { %274 = vmatpush3.bf16.xpose.msk.msra.mxu0 %vm424_vm2, %v272_v11 }
  0x3c   :  { %275 = vmatprep.subr.bf16.mxu0 %v379_v0 }
  0x43   :  { %278 = vmatpush3.bf16.xpose.msk.msra.mxu0 %vm424_vm2, %v276_v14 }
  0x44   :  { %279 = vmatprep.subr.bf16.mxu0 %v379_v0 }
  0x4b   :  { %282 = vmatpush3.bf16.xpose.msk.msra.mxu0 %vm424_vm2, %v280_v17 }
  0x4c   :  { %283 = vmatprep.subr.bf16.mxu0 %v379_v0 }
  0x53   :  { %286 = vmatpush3.bf16.xpose.msk.msra.mxu0 %vm424_vm2, %v284_v20 }
  0x54   :  { %287 = vmatprep.subr.bf16.mxu0 %v379_v0 }
  0x5b   :  { %290 = vmatpush3.bf16.xpose.msk.msra.mxu0 %vm424_vm2, %v288_v23 }
  0x5c   :  { %291 = vmatprep.subr.bf16.mxu0 %v379_v0 }
  0x63   :  { %294 = vmatpush3.bf16.xpose.msk.msra.mxu0 %vm424_vm2, %v292_v26 }
  0x6a   :  { %261 = vmatmul.mubr.msk.f32.vlgmr.msra.gmra.mrb[0].mxu0 %vm55_vm1, %v38_v27 }
 0x13d   :  { %v173_v28 = vpop.f32.mrb[0].mxu0 }
 0x13e   :  { %177 = vst [vmem:[#allocation7] sm:$0xff] %v173_v28  ;;  %v262_v29 = vpop.f32.mrb[1].mxu0 }
 0x13f   :  { %358 = shalt.err (!%p355_p6)
}
 0x140   :  { %s359_s11 = scalar_lea.hbm %s459_s2, 128 }
 0x141   :  { %p360_p7 = scmp.ne.s32.totalorder %s459_s2, %s359_s11  ;;  %p363_p8 = scmp.lt.u32.totalorder %s359_s11, %s459_s2 }
 0x143   :  { %p365_p9 = pnand %p363_p8, %p360_p7 }
 0x145   :  { %368 = shalt.err (!%p365_p9)
}
 0x146   :  { %187 = dma.vmem_to_hbm [thread:$0]  %s185_s7, 128, %s459_s2, [#allocation4]  }
 0x147   :  { %373 = dma.done.wait [#allocation4], 128  }
 0x148   :  { %374 = vsyncadd [#allocation4], 4294967168 }
 0x149   :  { %191 = vsyncpa [#allocation3], 1 }
 0x14a   :  { %192 = vsyncpa [#allocation6], 1 }
 0x14b   :  { %193 = vsyncpa [#allocation4], 1 }

</bundles_post_ra>
